<compile_context>
chip_gen: v7x
topology: tpu7x:2x2x1
jax: 0.10.0
libtpu: 0.0.40
codegen_flags: <defaults>
</compile_context>

<pallas_src>
import jax
import jax.numpy as jnp
from jax.experimental import pallas as pl
from jax.experimental.pallas import tpu as pltpu


# Below this, kernel-launch + DMA-descriptor overhead dominates a pure copy;
# returning `src` is literally free and exactly equivalent.
_BYPASS_BYTES = 1 << 20  # 1 MiB


def _dma_identity_kernel(src_hbm, out_hbm, sem):
    """Placeholder forward body: one HBM->HBM DMA copy of the whole array.

    No VMEM bounce, no grid pipeline: a single large DMA descriptor runs at
    the HBM roofline with minimal bundle count on v5e/v6e/v7x alike.
    """
    cp = pltpu.make_async_copy(src_hbm, out_hbm, sem)
    cp.start()
    cp.wait()


def _identity_via_dma(src: jax.Array) -> jax.Array:
    return pl.pallas_call(
        _dma_identity_kernel,
        out_shape=jax.ShapeDtypeStruct(src.shape, src.dtype),
        in_specs=[pl.BlockSpec(memory_space=pl.ANY)],   # raw HBM ref, no auto-DMA
        out_specs=pl.BlockSpec(memory_space=pl.ANY),    # raw HBM ref, we DMA into it
        scratch_shapes=[pltpu.SemaphoreType.DMA],
    )(src)


def seq2seq_forward(src: jax.Array,
                    trg: jax.Array | None = None,
                    *,
                    force_kernel: bool = False) -> jax.Array:
    """Pallas wrapper matching Seq2Seq.forward(src, trg).

    The reference forward is abstract (raises NotImplementedError), so this is
    an identity over `src`.  `trg` is shape-checked only and never DMA'd.

    Small inputs short-circuit (no kernel at all).  Larger inputs — or any
    input when force_kernel=True — go through a single HBM->HBM DMA kernel.
    """
    if trg is not None:
        # Guard against wiring bugs once a real forward is implemented.
        assert trg.shape[-1] == src.shape[-1], (
            f"hidden dim mismatch: src {src.shape} vs trg {trg.shape}")

    nbytes = src.size * src.dtype.itemsize
    if not force_kernel and nbytes < _BYPASS_BYTES:
        # Identity of a small array: a kernel would be pure launch overhead.
        return src

    return _identity_via_dma(src)


if __name__ == "__main__":
    key = jax.random.PRNGKey(0)
    k_src, k_trg = jax.random.split(key)

    # Small shapes consistent with a seq2seq interface:
    # batch=2, seq_len=8, hidden=32.
    src = jax.random.normal(k_src, (2, 8, 32), dtype=jnp.float32)
    trg = jax.random.normal(k_trg, (2, 8, 32), dtype=jnp.float32)

    # 1) Default path: tiny input -> short-circuit identity (no kernel).
    out_fast = seq2seq_forward(src, trg)
    out_fast = jax.block_until_ready(out_fast)
    assert out_fast.shape == src.shape
    assert bool(jnp.allclose(out_fast, src))

    # 2) Kernel path: force the single HBM->HBM DMA Pallas kernel to run once.
    out_kernel = seq2seq_forward(src, trg, force_kernel=True)
    out_kernel = jax.block_until_ready(out_kernel)
    assert out_kernel.shape == src.shape
    assert bool(jnp.allclose(out_kernel, src))

    print("KERNEL_OK")
</pallas_src>

<mosaic_0001>
module attributes {stable_mosaic.version = 11 : i64} {
  func.func @_dma_identity_kernel(%arg0: memref<2x8x32xf32, #tpu.memory_space<any>>, %arg1: memref<2x8x32xf32, #tpu.memory_space<any>>, %arg2: memref<!tpu.dma_semaphore, #tpu.memory_space<semaphore_mem>>) attributes {dimension_semantics = [], scalar_prefetch = 0 : i64, scratch_operands = 1 : i64, tpu.core_type = #tpu.core_type<tc>} {
    tpu.enqueue_dma source(%arg0 : memref<2x8x32xf32, #tpu.memory_space<any>>) target(%arg1 : memref<2x8x32xf32, #tpu.memory_space<any>>) target_semaphore(%arg2 : memref<!tpu.dma_semaphore, #tpu.memory_space<semaphore_mem>>)
    tpu.wait_dma2 semaphore(%arg2 : memref<!tpu.dma_semaphore, #tpu.memory_space<semaphore_mem>>) src(%arg0 : memref<2x8x32xf32, #tpu.memory_space<any>>) dst(%arg1 : memref<2x8x32xf32, #tpu.memory_space<any>>)
    return
  }
}

</mosaic_0001>

<bundles_post_ra>
// kernel: tpu_custom_call.1
= control target key start
LH: loop header
LB: loop body
LE: loop exit
PB: predicated region body
PF: predicated region fallthrough
CT: control target
= control target key end

     0   :  { %s35_s6 = smov [#allocation2]   ;;  %s36_s7 = smov [#allocation3]   ;;  %s54_s0 = inlined_call_operand.hbm [shape: f32[2,8,32], index: 0, kind: input, shape index: {}]   ;;  %s55_s1 = inlined_call_operand.hbm [shape: f32[2,8,32], index: 1, kind: output, shape index: {}]  }
   0x1   :  { %s37_s8 = smov 0  }
   0x2   :  { %18 = dma.general %s54_s0, 256, %s55_s1, %s35_s6, %s36_s7, [#allocation4], %s37_s8, 0  }
   0x3   :  { %33 = dma.done.wait [#allocation2], 256 }
   0x4   :  { %34 = vsyncadd [#allocation2], 4294967040 }
   0x5   :  { %23 = vsyncmov [#allocation2] }
   0x8   :  { %s24_s13 = vpop.sfrf %23 }
   0x9   :  { %p29_p0 = scmp.ne.s32.totalorder %s24_s13, 0 }
   0xb   :  { %28 = shalt.err (%p29_p0)  }

</bundles_post_ra>
